<compile_context>
chip_gen: v5e
topology: v5e:2x2
jax: 0.10.0
libtpu: 0.0.40
codegen_flags: <defaults>
</compile_context>

<pallas_src>
import functools

import jax
import jax.numpy as jnp
from jax import lax
from jax.experimental import pallas as pl
from jax.experimental.pallas import tpu as pltpu

NEG_SLOPE = 0.2
BN_EPS = 1e-5


def _leaky(x):
    # max-based LeakyReLU: mul+max (2 VPU ops) instead of cmp+mul+select.
    return jnp.maximum(x, NEG_SLOPE * x)


def _round_up(x, m):
    return (x + m - 1) // m * m


def _conv1_compute_dtype():
    """bf16 conv1 math on chips with a native bf16 VPU (v6e / v7x), else f32."""
    try:
        kind = jax.devices()[0].device_kind.lower()
    except Exception:
        return jnp.float32
    if ("v6" in kind) or ("v7" in kind) or ("7x" in kind):
        return jnp.bfloat16
    return jnp.float32


def _vmem_limit_bytes(tr, cache_cols, cdt):
    """Rough per-generation VMEM budget: tile temporaries + IO + y-cache."""
    cb = 2 if cdt == jnp.bfloat16 else 4
    per_col = (8 * 4            # xt tile (f32)
               + 2 * 32 * cb    # w1a / w1b broadcasts
               + 4 * 32 * cb    # conv1 slabs (cks)
               + 128 * 2        # patch_t (bf16)
               + 2 * 64 * 4)    # y + yr (f32)
    need = (per_col * tr
            + 2 * 8 * tr * 4 + 2 * tr * 4   # double-buffered taps + output
            + 64 * cache_cols * 2           # persistent y-cache (bf16)
            + (4 << 20))                    # headroom
    # Clamp to 48 MiB: fine on v5e/v6e (128 MiB physical) and v7x (64 MiB).
    return int(min(max(32 << 20, need), 48 << 20))


def _conv_pipeline(xt_ref, w1_ref, w2_ref, cdt):
    """conv1 + LeakyReLU + conv2 for one row tile, transposed layout.

    xt_ref : (8, TR)    raw-input taps; row d holds mp[2t+d] (rows 5..7 zero).
    w1_ref : (32, 2)    conv1 weight  (C_out, k), f32.
    w2_ref : (64, 128)  conv2 weight  (C_out, k*C_in), bf16.
    cdt    : conv1 compute dtype (bf16 on v6e/v7x, f32 otherwise).
    returns y : (64, TR) float32 conv2 output; channels on sublanes,
    flattened (batch*time) output rows on lanes.
    """
    tr = xt_ref.shape[1]
    # Hoist the conv1-weight broadcasts once (JAX does not CSE broadcasts).
    w1 = w1_ref[...].astype(cdt)                             # (32, 2)
    w1a = jnp.broadcast_to(w1[:, 0:1], (32, tr))             # tap-0 weights
    w1b = jnp.broadcast_to(w1[:, 1:2], (32, tr))             # tap-1 weights
    rows = [xt_ref[k:k + 1, :].astype(cdt) for k in range(5)]
    # conv1 (+LeakyReLU) at the 4 positions 2t+k feeding conv2 output column t,
    # cast to bf16 per slab so patch_t is assembled with bf16 stores only.
    cks = [_leaky(w1a * rows[k] + w1b * rows[k + 1]).astype(jnp.bfloat16)
           for k in range(4)]                                # 4 x (32, TR) bf16
    patch_t = jnp.concatenate(cks, axis=0)                   # (128, TR): im2col^T, VMEM only
    # conv2 (32->64, k=4, s=2) == one MXU matmul; bf16 operands, f32 accumulate.
    return jnp.dot(w2_ref[...], patch_t,
                   preferred_element_type=jnp.float32)       # (64, TR)


def _disc_fused_kernel(n_rows, cache_y, cdt,   # statics (via functools.partial)
                       xt_ref,                 # (8, TR)    input taps (f32)
                       w1_ref,                 # (32, 2)    conv1 weight
                       w2_ref,                 # (64, 128)  conv2 weight (bf16)
                       g_ref, b_ref,           # (64, 1)    BN gamma / beta
                       w6_ref,                 # (64, 1)    conv6 weight
                       out_ref,                # (1, TR)    sigmoid output (lane-dense)
                       sum_ref, sq_ref,        # VMEM (64,1) f32 BN accumulators
                       *cache_refs):           # optional (64, M_pad) bf16 y-cache
    phase = pl.program_id(0)
    tile = pl.program_id(1)
    tr = out_ref.shape[1]

    @pl.when((phase == 0) & (tile == 0))
    def _init():
        sum_ref[...] = jnp.zeros_like(sum_ref)
        sq_ref[...] = jnp.zeros_like(sq_ref)

    def _accumulate(y):
        # Zero-padded tail columns contribute 0 to both sums -> stats exact.
        # TODO(synk): E[y^2]-E[y]^2 in f32 can lose precision for very large
        # batches / large means; a Chan-style per-tile combine would be safer.
        sum_ref[...] += jnp.sum(y, axis=1, keepdims=True)
        sq_ref[...] += jnp.sum(y * y, axis=1, keepdims=True)

    def _bn_head(y):
        inv_n = 1.0 / float(n_rows)
        mean = sum_ref[...] * inv_n                          # (64, 1)
        var = jnp.maximum(sq_ref[...] * inv_n - mean * mean, 0.0)
        scale = lax.rsqrt(var + BN_EPS) * g_ref[...]
        shift = b_ref[...] - mean * scale
        yr = _leaky(y * scale + shift)                       # (64, TR)
        # conv6 (64 -> 1, k=1): VPU multiply + sublane reduce; keeps MXU free.
        z = jnp.sum(yr * w6_ref[...], axis=0, keepdims=True)  # (1, TR)
        # sigmoid via tanh: routes to the EUP slot and is stable for all z.
        out_ref[...] = 0.5 * (jnp.tanh(0.5 * z) + 1.0)

    if cache_y:
        # Fast path: phase 0 computes y once, caches it in persistent VMEM as
        # bf16; phase 1 skips the whole conv1/im2col/MXU recompute.
        ycache_ref = cache_refs[0]

        @pl.when(phase == 0)
        def _stats_pass():
            y = _conv_pipeline(xt_ref, w1_ref, w2_ref, cdt)  # (64, TR) f32
            start = pl.multiple_of(tile * tr, tr)
            ycache_ref[:, pl.ds(start, tr)] = y.astype(jnp.bfloat16)
            _accumulate(y)

        @pl.when(phase == 1)
        def _apply_pass():
            start = pl.multiple_of(tile * tr, tr)
            _bn_head(ycache_ref[:, pl.ds(start, tr)].astype(jnp.float32))
    else:
        # Recompute path (large M): phase 1 re-runs the cheap conv pipeline
        # instead of spilling y to HBM (cheaper on low-bandwidth chips).
        y = _conv_pipeline(xt_ref, w1_ref, w2_ref, cdt)      # (64, TR) f32

        @pl.when(phase == 0)
        def _stats_pass():
            _accumulate(y)

        @pl.when(phase == 1)
        def _apply_pass():
            _bn_head(y)


def discriminator_forward(m, w1, w2, gamma, beta, w6, *,
                          max_tile_rows=4096,
                          y_cache_budget_bytes=16 * 1024 * 1024):
    """m: (N, 1, L) float32.  Returns (N, 1, (L+1)//2 + 1) float32."""
    N, _, L = m.shape
    L2 = (L + 1) // 2 + 1          # conv2 / conv6 / output length
    M = N * L2                     # flattened (batch, time) output rows

    TR = min(_round_up(max_tile_rows, 128), _round_up(M, 128))  # lane-tile size
    M_pad = _round_up(M, TR)
    num_tiles = M_pad // TR

    # Cache y across phases when the (64, M_pad) bf16 slab fits the budget.
    cache_y = (64 * M_pad * 2) <= int(y_cache_budget_bytes)
    cdt = _conv1_compute_dtype()

    # --- tiny wrapper-side layout plumbing (all on the 1-channel raw input) ---
    # conv1 pad(2) and conv2 pad(1) fold into one zero-pad of 3: with no conv1
    # bias and LeakyReLU(0)=0, conv2's padding columns equal conv1(0) outputs.
    # (Invariant: breaks if conv1 ever gains a bias.)
    mp = jnp.pad(m[:, 0, :], ((0, 0), (3, 3)))                          # (N, L+6)
    # 5-tap im2col on the raw input via strided slices (no gather):
    # tap[d, n, t] = mp[n, 2t + d].
    taps = [lax.slice(mp, (0, d), (N, d + 2 * (L2 - 1) + 1), (1, 2))
            for d in range(5)]                                          # 5 x (N, L2)
    xt = jnp.stack(taps, axis=0).reshape(5, M)                          # (5, M)
    # Kept f32: bf16 taps would sublane-pack 2 rows/register and make the
    # per-row slices in the kernel pay VPU unpacks for a tiny HBM saving.
    xt = jnp.pad(xt, ((0, 3), (0, M_pad - M)))                          # (8, M_pad)

    w1m = w1[:, 0, :]                                                   # (32, 2)
    # conv2 weight -> (C_out, k*C_in) so y^T = W2m @ patch^T; bf16 MXU operand.
    w2m = jnp.transpose(w2, (0, 2, 1)).reshape(64, 4 * 32).astype(jnp.bfloat16)
    g_col = gamma.reshape(64, 1).astype(jnp.float32)
    b_col = beta.reshape(64, 1).astype(jnp.float32)
    w6_col = w6.reshape(64, 1).astype(jnp.float32)

    if cache_y:
        # Phase 1 reads the cache, not the taps: pin the tap block to index 0
        # during phase 1 so its HBM reads are not repeated.
        tap_map = lambda p, i: (0, i * (1 - p))
    else:
        tap_map = lambda p, i: (0, i)

    scratch = [pltpu.VMEM((64, 1), jnp.float32),   # per-channel sum
               pltpu.VMEM((64, 1), jnp.float32)]   # per-channel sum of squares
    if cache_y:
        scratch.append(pltpu.VMEM((64, M_pad), jnp.bfloat16))  # persistent y

    out = pl.pallas_call(
        functools.partial(_disc_fused_kernel, M, cache_y, cdt),
        out_shape=jax.ShapeDtypeStruct((1, M_pad), jnp.float32),
        grid_spec=pltpu.PrefetchScalarGridSpec(
            num_scalar_prefetch=0,
            grid=(2, num_tiles),                                # (BN phase, row tiles)
            in_specs=[
                pl.BlockSpec((8, TR), tap_map),                 # input taps
                pl.BlockSpec((32, 2), lambda p, i: (0, 0)),     # conv1 weight
                pl.BlockSpec((64, 128), lambda p, i: (0, 0)),   # conv2 weight
                pl.BlockSpec((64, 1), lambda p, i: (0, 0)),     # BN gamma
                pl.BlockSpec((64, 1), lambda p, i: (0, 0)),     # BN beta
                pl.BlockSpec((64, 1), lambda p, i: (0, 0)),     # conv6 weight
            ],
            # (0, i*p): all phase-0 steps alias output block 0, so no
            # uninitialized block is ever flushed to HBM; phase 1 writes each
            # block exactly once.
            out_specs=pl.BlockSpec((1, TR), lambda p, i: (0, i * p)),
            scratch_shapes=scratch,
        ),
        compiler_params=pltpu.CompilerParams(
            # Both axes 'arbitrary': the phase axis must run 0-then-1, and the
            # tile axis carries the cross-tile BN accumulator in per-core
            # scratch, so it must not be sharded across TensorCores.
            dimension_semantics=("arbitrary", "arbitrary"),
            vmem_limit_bytes=_vmem_limit_bytes(TR, M_pad if cache_y else 0, cdt),
        ),
    )(xt, w1m, w2m, g_col, b_col, w6_col)

    return out[0, :M].reshape(N, L2)[:, None, :]


# ---------------------------------------------------------------------------
# Pure-JAX reference (XLA convs, f32) for correctness checking.
# ---------------------------------------------------------------------------
def reference_forward(m, w1, w2, gamma, beta, w6):
    dn = ('NCH', 'OIH', 'NCH')
    o = lax.conv_general_dilated(m, w1, (1,), [(2, 2)], dimension_numbers=dn)
    o = jnp.where(o > 0, o, NEG_SLOPE * o)
    o = lax.conv_general_dilated(o, w2, (2,), [(1, 1)], dimension_numbers=dn)
    mean = jnp.mean(o, axis=(0, 2), keepdims=True)
    var = jnp.mean((o - mean) ** 2, axis=(0, 2), keepdims=True)
    o = (o - mean) / jnp.sqrt(var + BN_EPS)
    o = o * gamma[None, :, None] + beta[None, :, None]
    o = jnp.where(o > 0, o, NEG_SLOPE * o)
    o = lax.conv_general_dilated(o, w6, (1,), [(0, 0)], dimension_numbers=dn)
    return jax.nn.sigmoid(o)


def _check(q, q_ref, name):
    # conv1 (v6e/v7x), conv2 MXU operands and the y-cache are bf16 with f32
    # accumulation -> bf16-level agreement vs the f32 reference.
    err = float(jnp.max(jnp.abs(q - q_ref)))
    if not bool(jnp.allclose(q, q_ref, rtol=2e-2, atol=2e-2)):
        raise AssertionError(f"{name}: mismatch vs reference, max abs err {err}")


if __name__ == "__main__":
    key = jax.random.PRNGKey(0)
    km, k1, k2, k6 = jax.random.split(key, 4)

    # Deterministic synthetic parameters (shapes from the module's __init__).
    w1 = jax.random.normal(k1, (32, 1, 2), jnp.float32) * 0.3     # conv1.weight
    w2 = jax.random.normal(k2, (64, 32, 4), jnp.float32) * 0.1    # conv2.weight
    w6 = jax.random.normal(k6, (1, 64, 1), jnp.float32) * 0.2     # conv6.weight
    gamma = jnp.ones((64,), jnp.float32)                          # bat2.weight
    beta = jnp.zeros((64,), jnp.float32)                          # bat2.bias
    # TODO(synk): BatchNorm running-stat (track_running_stats) buffer updates are
    # a training-time side effect and are not materialized; forward output is
    # unaffected (train mode uses batch statistics).

    # --- small shape (single tile, y-cache fast path) ---
    N, L = 2, 16
    m = jax.random.normal(km, (N, 1, L), jnp.float32)
    q = jax.block_until_ready(jax.jit(discriminator_forward)(m, w1, w2, gamma, beta, w6))
    assert q.shape == (N, 1, (L + 1) // 2 + 1), q.shape
    _check(q, reference_forward(m, w1, w2, gamma, beta, w6), "small/cache")

    # --- multi-tile shape: exercise both the y-cache and recompute paths ---
    N2, L2 = 4, 250
    m2 = jax.random.normal(jax.random.PRNGKey(1), (N2, 1, L2), jnp.float32)
    q2_ref = reference_forward(m2, w1, w2, gamma, beta, w6)
    for budget in (16 * 1024 * 1024, 0):   # cache on / cache off (recompute)
        fwd = jax.jit(functools.partial(discriminator_forward,
                                        max_tile_rows=128,
                                        y_cache_budget_bytes=budget))
        q2 = jax.block_until_ready(fwd(m2, w1, w2, gamma, beta, w6))
        assert q2.shape == (N2, 1, (L2 + 1) // 2 + 1), q2.shape
        _check(q2, q2_ref, f"multi-tile/budget={budget}")

    print("KERNEL_OK")
</pallas_src>

<mosaic_0001>
module attributes {stable_mosaic.version = 11 : i64} {
  func.func @_disc_fused_kernel(%arg0: i32, %arg1: i32, %arg2: memref<8x128xf32, #tpu.memory_space<vmem>>, %arg3: memref<32x2xf32, #tpu.memory_space<vmem>>, %arg4: memref<64x128xbf16, #tpu.memory_space<vmem>>, %arg5: memref<64x1xf32, #tpu.memory_space<vmem>>, %arg6: memref<64x1xf32, #tpu.memory_space<vmem>>, %arg7: memref<64x1xf32, #tpu.memory_space<vmem>>, %arg8: memref<1x128xf32, #tpu.memory_space<vmem>>, %arg9: memref<64x1xf32, #tpu.memory_space<vmem>>, %arg10: memref<64x1xf32, #tpu.memory_space<vmem>>, %arg11: memref<64x128xbf16, #tpu.memory_space<vmem>>) attributes {dimension_semantics = [#tpu.dimension_semantics<arbitrary>, #tpu.dimension_semantics<arbitrary>], iteration_bounds = array<i64: 2, 1>, scalar_prefetch = 0 : i64, scratch_operands = 3 : i64, tpu.core_type = #tpu.core_type<tc>, window_params = [{transform_indices = @transform_0, window_bounds = array<i64: 8, 128>}, {pipeline_mode = #tpu.pipeline_mode<synchronous>, transform_indices = @transform_1, window_bounds = array<i64: 32, 2>}, {pipeline_mode = #tpu.pipeline_mode<synchronous>, transform_indices = @transform_2, window_bounds = array<i64: 64, 128>}, {pipeline_mode = #tpu.pipeline_mode<synchronous>, transform_indices = @transform_3, window_bounds = array<i64: 64, 1>}, {pipeline_mode = #tpu.pipeline_mode<synchronous>, transform_indices = @transform_4, window_bounds = array<i64: 64, 1>}, {pipeline_mode = #tpu.pipeline_mode<synchronous>, transform_indices = @transform_5, window_bounds = array<i64: 64, 1>}, {transform_indices = @transform_6, window_bounds = array<i64: 1, 128>}]} {
    %c0_i32 = arith.constant 0 : i32
    %0 = arith.cmpi eq, %arg0, %c0_i32 : i32
    %c0_i32_0 = arith.constant 0 : i32
    %1 = arith.cmpi eq, %arg1, %c0_i32_0 : i32
    %2 = arith.andi %0, %1 : i1
    %3 = arith.extui %2 : i1 to i32
    %c0_i32_1 = arith.constant 0 : i32
    %4 = arith.cmpi ne, %3, %c0_i32_1 : i32
    scf.if %4 {
      %cst = arith.constant 0.000000e+00 : f32
      %11 = vector.broadcast %cst : f32 to vector<64x1xf32>
      %c0 = arith.constant 0 : index
      %c0_5 = arith.constant 0 : index
      %12 = vector.load %arg9[%c0, %c0_5] : memref<64x1xf32, #tpu.memory_space<vmem>>, vector<64x1xf32>
      tpu.vector_store %arg9[%c0, %c0_5], %11 {strides = array<i32>} : memref<64x1xf32, #tpu.memory_space<vmem>>, vector<64x1xf32>,
      %cst_6 = arith.constant 0.000000e+00 : f32
      %13 = vector.broadcast %cst_6 : f32 to vector<64x1xf32>
      %c0_7 = arith.constant 0 : index
      %c0_8 = arith.constant 0 : index
      %14 = vector.load %arg10[%c0_7, %c0_8] : memref<64x1xf32, #tpu.memory_space<vmem>>, vector<64x1xf32>
      tpu.vector_store %arg10[%c0_7, %c0_8], %13 {strides = array<i32>} : memref<64x1xf32, #tpu.memory_space<vmem>>, vector<64x1xf32>,
    } else {
    }
    %c0_i32_2 = arith.constant 0 : i32
    %5 = arith.cmpi eq, %arg0, %c0_i32_2 : i32
    %6 = arith.extui %5 : i1 to i32
    %c0_i32_3 = arith.constant 0 : i32
    %7 = arith.cmpi ne, %6, %c0_i32_3 : i32
    scf.if %7 {
      %c0 = arith.constant 0 : index
      %c0_5 = arith.constant 0 : index
      %11 = vector.load %arg3[%c0, %c0_5] : memref<32x2xf32, #tpu.memory_space<vmem>>, vector<32x2xf32>
      %12 = vector.extract_strided_slice %11 {offsets = [0, 0], sizes = [32, 1], strides = [1, 1]} : vector<32x2xf32> to vector<32x1xf32>
      %13 = vector.shape_cast %12 : vector<32x1xf32> to vector<32x1xf32>
      %14 = vector.broadcast %13 : vector<32x1xf32> to vector<32x128xf32>
      %15 = vector.extract_strided_slice %11 {offsets = [0, 1], sizes = [32, 1], strides = [1, 1]} : vector<32x2xf32> to vector<32x1xf32>
      %16 = vector.shape_cast %15 : vector<32x1xf32> to vector<32x1xf32>
      %17 = vector.broadcast %16 : vector<32x1xf32> to vector<32x128xf32>
      %c0_6 = arith.constant 0 : index
      %c0_7 = arith.constant 0 : index
      %18 = vector.load %arg2[%c0_6, %c0_7] : memref<8x128xf32, #tpu.memory_space<vmem>>, vector<1x128xf32>
      %c1 = arith.constant 1 : index
      %c0_8 = arith.constant 0 : index
      %19 = vector.load %arg2[%c1, %c0_8] : memref<8x128xf32, #tpu.memory_space<vmem>>, vector<1x128xf32>
      %c2 = arith.constant 2 : index
      %c0_9 = arith.constant 0 : index
      %20 = vector.load %arg2[%c2, %c0_9] : memref<8x128xf32, #tpu.memory_space<vmem>>, vector<1x128xf32>
      %c3 = arith.constant 3 : index
      %c0_10 = arith.constant 0 : index
      %21 = vector.load %arg2[%c3, %c0_10] : memref<8x128xf32, #tpu.memory_space<vmem>>, vector<1x128xf32>
      %c4 = arith.constant 4 : index
      %c0_11 = arith.constant 0 : index
      %22 = vector.load %arg2[%c4, %c0_11] : memref<8x128xf32, #tpu.memory_space<vmem>>, vector<1x128xf32>
      %23 = vector.broadcast %18 : vector<1x128xf32> to vector<32x128xf32>
      %24 = arith.mulf %14, %23 : vector<32x128xf32>
      %25 = vector.broadcast %19 : vector<1x128xf32> to vector<32x128xf32>
      %26 = arith.mulf %17, %25 : vector<32x128xf32>
      %27 = arith.addf %24, %26 : vector<32x128xf32>
      %cst = arith.constant 2.000000e-01 : f32
      %28 = vector.broadcast %cst : f32 to vector<32x128xf32>
      %29 = arith.mulf %28, %27 : vector<32x128xf32>
      %30 = arith.maximumf %27, %29 : vector<32x128xf32>
      %31 = arith.truncf %30 : vector<32x128xf32> to vector<32x128xbf16>
      %32 = vector.broadcast %19 : vector<1x128xf32> to vector<32x128xf32>
      %33 = arith.mulf %14, %32 : vector<32x128xf32>
      %34 = vector.broadcast %20 : vector<1x128xf32> to vector<32x128xf32>
      %35 = arith.mulf %17, %34 : vector<32x128xf32>
      %36 = arith.addf %33, %35 : vector<32x128xf32>
      %cst_12 = arith.constant 2.000000e-01 : f32
      %37 = vector.broadcast %cst_12 : f32 to vector<32x128xf32>
      %38 = arith.mulf %37, %36 : vector<32x128xf32>
      %39 = arith.maximumf %36, %38 : vector<32x128xf32>
      %40 = arith.truncf %39 : vector<32x128xf32> to vector<32x128xbf16>
      %41 = vector.broadcast %20 : vector<1x128xf32> to vector<32x128xf32>
      %42 = arith.mulf %14, %41 : vector<32x128xf32>
      %43 = vector.broadcast %21 : vector<1x128xf32> to vector<32x128xf32>
      %44 = arith.mulf %17, %43 : vector<32x128xf32>
      %45 = arith.addf %42, %44 : vector<32x128xf32>
      %cst_13 = arith.constant 2.000000e-01 : f32
      %46 = vector.broadcast %cst_13 : f32 to vector<32x128xf32>
      %47 = arith.mulf %46, %45 : vector<32x128xf32>
      %48 = arith.maximumf %45, %47 : vector<32x128xf32>
      %49 = arith.truncf %48 : vector<32x128xf32> to vector<32x128xbf16>
      %50 = vector.broadcast %21 : vector<1x128xf32> to vector<32x128xf32>
      %51 = arith.mulf %14, %50 : vector<32x128xf32>
      %52 = vector.broadcast %22 : vector<1x128xf32> to vector<32x128xf32>
      %53 = arith.mulf %17, %52 : vector<32x128xf32>
      %54 = arith.addf %51, %53 : vector<32x128xf32>
      %cst_14 = arith.constant 2.000000e-01 : f32
      %55 = vector.broadcast %cst_14 : f32 to vector<32x128xf32>
      %56 = arith.mulf %55, %54 : vector<32x128xf32>
      %57 = arith.maximumf %54, %56 : vector<32x128xf32>
      %58 = arith.truncf %57 : vector<32x128xf32> to vector<32x128xbf16>
      %59 = tpu.concatenate %31, %40, %49, %58 in 0 : vector<32x128xbf16>, vector<32x128xbf16>, vector<32x128xbf16>, vector<32x128xbf16> -> vector<128x128xbf16>
      %c0_15 = arith.constant 0 : index
      %c0_16 = arith.constant 0 : index
      %60 = vector.load %arg4[%c0_15, %c0_16] : memref<64x128xbf16, #tpu.memory_space<vmem>>, vector<64x128xbf16>
      %cst_17 = arith.constant dense<0.000000e+00> : vector<64x128xf32>
      %61 = tpu.matmul %60, %59, %cst_17 {dimension_numbers = #tpu.dot_dimension_numbers<[1], [0], [0], [1], [0, 0, 1, 1], [], []>} : vector<64x128xbf16>, vector<128x128xbf16>, vector<64x128xf32> -> vector<64x128xf32>
      %c128_i32 = arith.constant 128 : i32
      %62 = arith.muli %arg1, %c128_i32 : i32
      %63 = tpu.assume_multiple %62, 128 : i32
      %64 = arith.truncf %61 : vector<64x128xf32> to vector<64x128xbf16>
      %c0_18 = arith.constant 0 : index
      %65 = arith.index_cast %63 : i32 to index
      %66 = vector.load %arg11[%c0_18, %65] : memref<64x128xbf16, #tpu.memory_space<vmem>>, vector<64x128xbf16>
      tpu.vector_store %arg11[%c0_18, %65], %64 {strides = array<i32>} : memref<64x128xbf16, #tpu.memory_space<vmem>>, vector<64x128xbf16>,
      %c0_19 = arith.constant 0 : index
      %c0_20 = arith.constant 0 : index
      %67 = vector.load %arg9[%c0_19, %c0_20] : memref<64x1xf32, #tpu.memory_space<vmem>>, vector<64x1xf32>
      %cst_21 = arith.constant dense<0.000000e+00> : vector<64xf32>
      %68 = vector.multi_reduction <add>, %61, %cst_21 [1] : vector<64x128xf32> to vector<64xf32>
      %69 = vector.shape_cast %68 : vector<64xf32> to vector<64x1xf32>
      %70 = arith.addf %67, %69 : vector<64x1xf32>
      %c0_22 = arith.constant 0 : index
      %c0_23 = arith.constant 0 : index
      %71 = vector.load %arg9[%c0_22, %c0_23] : memref<64x1xf32, #tpu.memory_space<vmem>>, vector<64x1xf32>
      tpu.vector_store %arg9[%c0_22, %c0_23], %70 {strides = array<i32>} : memref<64x1xf32, #tpu.memory_space<vmem>>, vector<64x1xf32>,
      %c0_24 = arith.constant 0 : index
      %c0_25 = arith.constant 0 : index
      %72 = vector.load %arg10[%c0_24, %c0_25] : memref<64x1xf32, #tpu.memory_space<vmem>>, vector<64x1xf32>
      %73 = arith.mulf %61, %61 : vector<64x128xf32>
      %cst_26 = arith.constant dense<0.000000e+00> : vector<64xf32>
      %74 = vector.multi_reduction <add>, %73, %cst_26 [1] : vector<64x128xf32> to vector<64xf32>
      %75 = vector.shape_cast %74 : vector<64xf32> to vector<64x1xf32>
      %76 = arith.addf %72, %75 : vector<64x1xf32>
      %c0_27 = arith.constant 0 : index
      %c0_28 = arith.constant 0 : index
      %77 = vector.load %arg10[%c0_27, %c0_28] : memref<64x1xf32, #tpu.memory_space<vmem>>, vector<64x1xf32>
      tpu.vector_store %arg10[%c0_27, %c0_28], %76 {strides = array<i32>} : memref<64x1xf32, #tpu.memory_space<vmem>>, vector<64x1xf32>,
    } else {
    }
    %c1_i32 = arith.constant 1 : i32
    %8 = arith.cmpi eq, %arg0, %c1_i32 : i32
    %9 = arith.extui %8 : i1 to i32
    %c0_i32_4 = arith.constant 0 : i32
    %10 = arith.cmpi ne, %9, %c0_i32_4 : i32
    scf.if %10 {
      %c128_i32 = arith.constant 128 : i32
      %11 = arith.muli %arg1, %c128_i32 : i32
      %12 = tpu.assume_multiple %11, 128 : i32
      %c0 = arith.constant 0 : index
      %13 = arith.index_cast %12 : i32 to index
      %14 = vector.load %arg11[%c0, %13] : memref<64x128xbf16, #tpu.memory_space<vmem>>, vector<64x128xbf16>
      %15 = arith.extf %14 : vector<64x128xbf16> to vector<64x128xf32>
      %c0_5 = arith.constant 0 : index
      %c0_6 = arith.constant 0 : index
      %16 = vector.load %arg9[%c0_5, %c0_6] : memref<64x1xf32, #tpu.memory_space<vmem>>, vector<64x1xf32>
      %cst = arith.constant 0.055555556 : f32
      %17 = vector.broadcast %cst : f32 to vector<64x1xf32>
      %18 = arith.mulf %16, %17 : vector<64x1xf32>
      %c0_7 = arith.constant 0 : index
      %c0_8 = arith.constant 0 : index
      %19 = vector.load %arg10[%c0_7, %c0_8] : memref<64x1xf32, #tpu.memory_space<vmem>>, vector<64x1xf32>
      %cst_9 = arith.constant 0.055555556 : f32
      %20 = vector.broadcast %cst_9 : f32 to vector<64x1xf32>
      %21 = arith.mulf %19, %20 : vector<64x1xf32>
      %22 = arith.mulf %18, %18 : vector<64x1xf32>
      %23 = arith.subf %21, %22 : vector<64x1xf32>
      %cst_10 = arith.constant 0.000000e+00 : f32
      %24 = vector.broadcast %cst_10 : f32 to vector<64x1xf32>
      %25 = arith.maximumf %23, %24 : vector<64x1xf32>
      %cst_11 = arith.constant 9.99999974E-6 : f32
      %26 = vector.broadcast %cst_11 : f32 to vector<64x1xf32>
      %27 = arith.addf %25, %26 : vector<64x1xf32>
      %28 = math.rsqrt %27 : vector<64x1xf32>
      %c0_12 = arith.constant 0 : index
      %c0_13 = arith.constant 0 : index
      %29 = vector.load %arg5[%c0_12, %c0_13] : memref<64x1xf32, #tpu.memory_space<vmem>>, vector<64x1xf32>
      %30 = arith.mulf %28, %29 : vector<64x1xf32>
      %c0_14 = arith.constant 0 : index
      %c0_15 = arith.constant 0 : index
      %31 = vector.load %arg6[%c0_14, %c0_15] : memref<64x1xf32, #tpu.memory_space<vmem>>, vector<64x1xf32>
      %32 = arith.mulf %18, %30 : vector<64x1xf32>
      %33 = arith.subf %31, %32 : vector<64x1xf32>
      %34 = vector.broadcast %30 : vector<64x1xf32> to vector<64x128xf32>
      %35 = arith.mulf %15, %34 : vector<64x128xf32>
      %36 = vector.broadcast %33 : vector<64x1xf32> to vector<64x128xf32>
      %37 = arith.addf %35, %36 : vector<64x128xf32>
      %cst_16 = arith.constant 2.000000e-01 : f32
      %38 = vector.broadcast %cst_16 : f32 to vector<64x128xf32>
      %39 = arith.mulf %38, %37 : vector<64x128xf32>
      %40 = arith.maximumf %37, %39 : vector<64x128xf32>
      %c0_17 = arith.constant 0 : index
      %c0_18 = arith.constant 0 : index
      %41 = vector.load %arg7[%c0_17, %c0_18] : memref<64x1xf32, #tpu.memory_space<vmem>>, vector<64x1xf32>
      %42 = vector.broadcast %41 : vector<64x1xf32> to vector<64x128xf32>
      %43 = arith.mulf %40, %42 : vector<64x128xf32>
      %cst_19 = arith.constant dense<0.000000e+00> : vector<128xf32>
      %44 = vector.multi_reduction <add>, %43, %cst_19 [0] : vector<64x128xf32> to vector<128xf32>
      %45 = vector.shape_cast %44 : vector<128xf32> to vector<1x128xf32>
      %cst_20 = arith.constant 5.000000e-01 : f32
      %46 = vector.broadcast %cst_20 : f32 to vector<1x128xf32>
      %47 = arith.mulf %46, %45 : vector<1x128xf32>
      %48 = math.tanh %47 : vector<1x128xf32>
      %cst_21 = arith.constant 1.000000e+00 : f32
      %49 = vector.broadcast %cst_21 : f32 to vector<1x128xf32>
      %50 = arith.addf %48, %49 : vector<1x128xf32>
      %cst_22 = arith.constant 5.000000e-01 : f32
      %51 = vector.broadcast %cst_22 : f32 to vector<1x128xf32>
      %52 = arith.mulf %51, %50 : vector<1x128xf32>
      %c0_23 = arith.constant 0 : index
      %c0_24 = arith.constant 0 : index
      %53 = vector.load %arg8[%c0_23, %c0_24] : memref<1x128xf32, #tpu.memory_space<vmem>>, vector<1x128xf32>
      tpu.vector_store %arg8[%c0_23, %c0_24], %52 {strides = array<i32>} : memref<1x128xf32, #tpu.memory_space<vmem>>, vector<1x128xf32>,
    } else {
    }
    return
  }
  func.func @transform_0(%arg0: i32, %arg1: i32) -> (i32, i32) {
    %c1_i32 = arith.constant 1 : i32
    %0 = arith.subi %c1_i32, %arg0 : i32
    %1 = arith.muli %arg1, %0 : i32
    %c0_i32 = arith.constant 0 : i32
    %c0_i32_0 = arith.constant 0 : i32
    return %c0_i32, %1 : i32, i32
  }
  func.func @transform_1(%arg0: i32, %arg1: i32) -> (i32, i32) {
    %c0_i32 = arith.constant 0 : i32
    %c0_i32_0 = arith.constant 0 : i32
    %c0_i32_1 = arith.constant 0 : i32
    return %c0_i32, %c0_i32_0 : i32, i32
  }
  func.func @transform_2(%arg0: i32, %arg1: i32) -> (i32, i32) {
    %c0_i32 = arith.constant 0 : i32
    %c0_i32_0 = arith.constant 0 : i32
    %c0_i32_1 = arith.constant 0 : i32
    return %c0_i32, %c0_i32_0 : i32, i32
  }
  func.func @transform_3(%arg0: i32, %arg1: i32) -> (i32, i32) {
    %c0_i32 = arith.constant 0 : i32
    %c0_i32_0 = arith.constant 0 : i32
    %c0_i32_1 = arith.constant 0 : i32
    return %c0_i32, %c0_i32_0 : i32, i32
  }
  func.func @transform_4(%arg0: i32, %arg1: i32) -> (i32, i32) {
    %c0_i32 = arith.constant 0 : i32
    %c0_i32_0 = arith.constant 0 : i32
    %c0_i32_1 = arith.constant 0 : i32
    return %c0_i32, %c0_i32_0 : i32, i32
  }
  func.func @transform_5(%arg0: i32, %arg1: i32) -> (i32, i32) {
    %c0_i32 = arith.constant 0 : i32
    %c0_i32_0 = arith.constant 0 : i32
    %c0_i32_1 = arith.constant 0 : i32
    return %c0_i32, %c0_i32_0 : i32, i32
  }
  func.func @transform_6(%arg0: i32, %arg1: i32) -> (i32, i32) {
    %0 = arith.muli %arg1, %arg0 : i32
    %c0_i32 = arith.constant 0 : i32
    %c0_i32_0 = arith.constant 0 : i32
    return %c0_i32, %0 : i32, i32
  }
}

</mosaic_0001>

<bundles_post_ra>
// kernel: squeeze.5
= control target key start
LH: loop header
LB: loop body
LE: loop exit
PB: predicated region body
PF: predicated region fallthrough
CT: control target
= control target key end

     0   :  { %s80_s0 = inlined_call_operand.vmem [shape: f32[18], index: 0, kind: input, shape index: {}]   ;;  %s81_s1 = inlined_call_operand.hbm [shape: f32[2,1,9], index: 1, kind: output, shape index: {}]  }
   0x1   :  { %v5_v0 = vld [vmem:[%s80_s0] sm:$0x1] }
   0x2   :  { %2 = vsyncpa [#allocation1], 0  ;;  %6 = vst [vmem:[#allocation3] sm:$0x1] %v5_v0  ;;  %vm8_vm0 = vcmask 72704   ;;  %s62_s0 = smov 119  }
   0x3   :  { %s63_s8 = smov [#allocation0]   ;;  %s27_s1 = sshll.u32 %s81_s1, 4  ;;  %s28_s1 = int_to_ptr.hbm [resolvable:$true] %s27_s1 }
   0x4   :  { %s25_s9 = sshll.u32 %s63_s8, 4  ;;  %s26_s9 = int_to_ptr.vmem [resolvable:$true] %s25_s9 }
   0x9   :  { %v10_v1 = vld [vmem:[#allocation3] sm:$0x1]  }
   0xa   :  { %v7_v2 = vld [vmem:[#allocation3] sm:$0x1]   ;;  %11 = vrot.lane.b32.xlu0 %v10_v1, %s62_s0 }
   0xb   :  { %9 = vst.msk [vmem:[#allocation2] sm:$0x1] %vm8_vm0, %v7_v2  }
  0x7c   :  { %v12_v3 = vpop.permute.xlu0 %11  }
  0x7d   :  { %15 = vst.msk [vmem:[#allocation2 + $0x1] sm:$0x1] %vm8_vm0, %v12_v3  }
  0x84   :  { %v18_v4 = vld [vmem:[#allocation2] sm:$0x3] }
  0x85   :  { %21 = vst [vmem:[#allocation0] sm:$0x3] %v18_v4 }
  0x86   :  { %30 = dma.vmem_to_hbm [thread:$0]  %s26_s9, 32, %s28_s1, [#allocation1]  }
  0x87   :  { %60 = dma.done.wait [#allocation1], 32  }
  0x88   :  { %61 = vsyncadd [#allocation1], 4294967264 }
  0x89   :  { %33 = vsyncpa [#allocation1], 1 }

// kernel: discriminator_forward.1
= control target key start
LH: loop header
LB: loop body
LE: loop exit
PB: predicated region body
PF: predicated region fallthrough
CT: control target
= control target key end

     0   :  { %s1346_s21 = smov 0   ;;  %s1348_s22 = smov 0   ;;  %s1735_s0 = inlined_call_operand.vmem [shape: f32[8,128], index: 0, kind: input, shape index: {}]   ;;  %s1736_s1 = inlined_call_operand.vmem [shape: f32[32,2], index: 1, kind: input, shape index: {}]   ;;  %s1737_s2 = inlined_call_operand.vmem [shape: bf16[64,128], index: 2, kind: input, shape index: {}]   ;;  %s1738_s3 = inlined_call_operand.vmem [shape: f32[64,1], index: 3, kind: input, shape index: {}]   ;;  %s1739_s4 = inlined_call_operand.vmem [shape: f32[64,1], index: 4, kind: input, shape index: {}]   ;;  %s1740_s5 = inlined_call_operand.vmem [shape: f32[64,1], index: 5, kind: input, shape index: {}]   ;;  %s1741_s6 = inlined_call_operand.vmem [shape: f32[1,128], index: 6, kind: output, shape index: {}]  }
   0x1   :  { %s1350_s23 = smov 0  }
   0x2 LB: > { %s28_s24 = sadd.s32 1, %s1301_s22  ;;  %p1130_p0 = scmp.ge.s32.totalorder %s1305_s23, 1  ;;  %s1305_s23 = sphi %s1350_s23, %s16_s23   ;;  %s1301_s22 = sphi %s1348_s22, %s1757_s22   ;;  %s1297_s21 = sphi %s1346_s21, %s1756_s21  }
   0x3   : > { %p30_p1 = scmp.ge.s32.totalorder %s28_s24, 2  ;;  %p233_p2 = scmp.lt.s32.totalorder %s1305_s23, 3 }
   0x5   : > { %s1759_s24 = smov (%p30_p1, %s28_s24), 0  ;;  %p234_p3 = pnand %p1130_p0, %p233_p2 }
   0x6   : > { %p276_p4 = scmp.eq.s32.totalorder (!%p234_p3), %s1297_s21, 0 }
   0x7   : > { %237 = sbr.rel (%p234_p3) target bundleno = 750 (0x2ee), region = 44 }
   0xc   : > { %281 = sbr.rel (!%p276_p4) target bundleno = 29 (0x1d), region = 48  ;;  %vm282_vm0 = vcmask (%p276_p4), 7168   ;;  %v1307_v0 = vmov (%p276_p4), 0.0  }
   0xd   : > { %283 = vst.msk [vmem:[#allocation2] sm:$0xff] (%p276_p4), %vm282_vm0, %v1307_v0 }
   0xe   : > { %284 = vst.msk [vmem:[#allocation2 + $0x8] sm:$0xff] (%p276_p4), %vm282_vm0, %v1307_v0 }
   0xf   : > { %285 = vst.msk [vmem:[#allocation2 + $0x10] sm:$0xff] (%p276_p4), %vm282_vm0, %v1307_v0 }
  0x10   : > { %286 = vst.msk [vmem:[#allocation2 + $0x18] sm:$0xff] (%p276_p4), %vm282_vm0, %v1307_v0 }
  0x11   : > { %287 = vst.msk [vmem:[#allocation2 + $0x20] sm:$0xff] %vm282_vm0, %v1307_v0 }
  0x12   : > { %288 = vst.msk [vmem:[#allocation2 + $0x28] sm:$0xff] %vm282_vm0, %v1307_v0 }
  0x13   : > { %289 = vst.msk [vmem:[#allocation2 + $0x30] sm:$0xff] %vm282_vm0, %v1307_v0 }
  0x14   : > { %290 = vst.msk [vmem:[#allocation2 + $0x38] sm:$0xff] %vm282_vm0, %v1307_v0 }
  0x15   : > { %291 = vst.msk [vmem:[#allocation3] sm:$0xff] %vm282_vm0, %v1307_v0 }
  0x16   : > { %292 = vst.msk [vmem:[#allocation3 + $0x8] sm:$0xff] %vm282_vm0, %v1307_v0 }
  0x17   : > { %293 = vst.msk [vmem:[#allocation3 + $0x10] sm:$0xff] %vm282_vm0, %v1307_v0 }
  0x18   : > { %294 = vst.msk [vmem:[#allocation3 + $0x18] sm:$0xff] %vm282_vm0, %v1307_v0 }
  0x19   : > { %295 = vst.msk [vmem:[#allocation3 + $0x20] sm:$0xff] %vm282_vm0, %v1307_v0 }
  0x1a   : > { %296 = vst.msk [vmem:[#allocation3 + $0x28] sm:$0xff] %vm282_vm0, %v1307_v0 }
  0x1b   : > { %297 = vst.msk [vmem:[#allocation3 + $0x30] sm:$0xff] %vm282_vm0, %v1307_v0 }
  0x1c   : > { %298 = vst.msk [vmem:[#allocation3 + $0x38] sm:$0xff] %vm282_vm0, %v1307_v0 }
  0x1d PF: > { %p1132_p5 = scmp.ne.s32.totalorder %s1297_s21, 0 }
  0x1f   : > { %301 = sbr.rel (%p1132_p5) target bundleno = 504 (0x1f8), region = 52 }
  0x24   : > { %v304_v1 = vld [vmem:[%s1736_s1 + $0x10] sm:$0xff]  ;;  %v1308_v2 = vmov 1   ;;  %v1309_v3 = vmov 0   ;;  %v302_v4 = vld [vmem:[%s1736_s1] sm:$0xff]  ;;  %v305_v5 = vld [vmem:[%s1736_s1 + $0x18] sm:$0xff]  ;;  %vm610_vm1 = vcmask 7168  }
  0x25   : > { %1254 = vset.pattern.permute.xlu1 %v1308_v2  ;;  %1253 = vset.pattern.permute.xlu0 %v1309_v3  ;;  %v303_v6 = vld [vmem:[%s1736_s1 + $0x8] sm:$0xff]  ;;  %v1259_v9 = vld [vmem:[%s1735_s0 + $0x3] ss:$0 sm:$0xff]  ;;  %v1260_v10 = vld [vmem:[%s1735_s0 + $0x4] ss:$0 sm:$0xff] }
  0x26   : > { %335 = vperm.xlu1 %1254, %v304_v1   ;;  %318 = vperm.xlu0 %1253, %v304_v1   ;;  %v1258_v16 = vld [vmem:[%s1735_s0 + $0x2] ss:$0 sm:$0xff]  ;;  %v1418_v27 = vld [vmem:[%s1735_s0 + $0x1] ss:$0 sm:$0xff]  ;;  %v1261_v63 = vld [vmem:[%s1735_s0] ss:$0 sm:$0xff] }
  0x27   : > { %1255 = vset.pattern.permute.xlu2 %v1309_v3 }
  0x28   : > { %308 = vperm.xlu2 %1255, %v302_v4  }
  0x2e   : > { %339 = vperm.xlu1 %1254, %v305_v5   ;;  %323 = vperm.xlu0 %1253, %v305_v5  }
  0x30   : > { %313 = vperm.xlu2 %1255, %v303_v6  }
  0x36   : > { %1256 = vset.pattern.permute.xlu0 %v1308_v2  ;;  %331 = vperm.xlu1 %1254, %v303_v6  }
  0x37   : > { %327 = vperm.xlu0 %1256, %v302_v4  }
  0x82   : > { %v1406_v11 = vpop.permute.xlu2 %308 }
  0x83   : > { %v398_v28 = vmul.f32 %v1258_v16, %v1406_v11  ;;  %v423_v30 = vmul.f32 %v1259_v9, %v1406_v11  ;;  %v373_v52 = vmul.f32 %v1418_v27, %v1406_v11 }
  0x8a   : > { %v314_v26 = vpop.permute.xlu2 %313 }
  0x8b   : > { %v399_v32 = vmul.f32 %v1258_v16, %v314_v26  ;;  %v424_v33 = vmul.f32 %v1259_v9, %v314_v26  ;;  %v374_v56 = vmul.f32 %v1418_v27, %v314_v26 }
  0x98   : > { %v1396_v7 = vpop.permute.xlu1 %335  ;;  %v1398_v8 = vpop.permute.xlu0 %318 }
  0x99   : > { %v430_v12 = vmul.f32 %v1260_v10, %v1396_v7  ;;  %v425_v13 = vmul.f32 %v1259_v9, %v1398_v8  ;;  %v405_v22 = vmul.f32 %v1259_v9, %v1396_v7  ;;  %v400_v23 = vmul.f32 %v1258_v16, %v1398_v8 }
  0x9a   : > { %v380_v44 = vmul.f32 %v1258_v16, %v1396_v7  ;;  %v375_v45 = vmul.f32 %v1418_v27, %v1398_v8 }
  0x9b   : > { %v434_v17 = vadd.f32 %v430_v12, %v425_v13  ;;  %v409_v35 = vadd.f32 %v405_v22, %v400_v23 }
  0x9c   : > { %v384_v59 = vadd.f32 %v380_v44, %v375_v45 }
  0x9d   : > { %v438_v24 = vmul.f32 0.2, %v434_v17  ;;  %v413_v51 = vmul.f32 0.2, %v409_v35 }
  0x9f   : > { %v442_v36 = vmax.f32 %v434_v17, %v438_v24  ;;  %v417_v4 = vmax.f32 %v409_v35, %v413_v51 }
  0xa0   : > { %v340_v14 = vpop.permute.xlu1 %339  ;;  %v324_v15 = vpop.permute.xlu0 %323 }
  0xa1   : > { %v431_v18 = vmul.f32 %v1260_v10, %v340_v14  ;;  %v426_v19 = vmul.f32 %v1259_v9, %v324_v15  ;;  %v406_v20 = vmul.f32 %v1259_v9, %v340_v14  ;;  %v401_v21 = vmul.f32 %v1258_v16, %v324_v15 }
  0xa2   : > { %v381_v37 = vmul.f32 %v1258_v16, %v340_v14  ;;  %v376_v40 = vmul.f32 %v1418_v27, %v324_v15  ;;  %v446_v54 = vpack.c.bf16 %v442_v36, %v442_v36  ;;  %v356_v5 = vmul.f32 %v1418_v27, %v340_v14 }
  0xa3   : > { %v435_v25 = vadd.f32 %v431_v18, %v426_v19  ;;  %v410_v31 = vadd.f32 %v406_v20, %v401_v21  ;;  %v388_v14 = vmul.f32 0.2, %v384_v59 }
  0xa4   : > { %v385_v55 = vadd.f32 %v381_v37, %v376_v40  ;;  %v490_v6 = vunpack.c.l.b16 %v446_v54 }
  0xa5   : > { %v439_v29 = vmul.f32 0.2, %v435_v25  ;;  %v414_v48 = vmul.f32 0.2, %v410_v31 }
  0xa6   : > { %v389_v12 = vmul.f32 0.2, %v385_v55 }
  0xa7   : > { %v443_v41 = vmax.f32 %v435_v25, %v439_v29  ;;  %v418_v0 = vmax.f32 %v410_v31, %v414_v48  ;;  %v355_v25 = vmul.f32 %v1418_v27, %v1396_v7  ;;  %v349_v29 = vmul.f32 %v1261_v63, %v314_v26 }
  0xa8   : > { %v332_v34 = vpop.permute.xlu1 %331  ;;  %v348_v26 = vmul.f32 %v1261_v63, %v1406_v11 }
  0xa9   : > { %v404_v38 = vmul.f32 %v1259_v9, %v332_v34  ;;  %v328_v39 = vpop.permute.xlu0 %327  ;;  %v429_v42 = vmul.f32 %v1260_v10, %v332_v34  ;;  %v447_v58 = vpack.c.bf16 %v443_v41, %v443_v41  ;;  %v379_v60 = vmul.f32 %v1258_v16, %v332_v34 }
  0xaa   : > { %v403_v43 = vmul.f32 %v1259_v9, %v328_v39  ;;  %v428_v47 = vmul.f32 %v1260_v10, %v328_v39  ;;  %v378_v62 = vmul.f32 %v1258_v16, %v328_v39  ;;  %v351_v10 = vmul.f32 %v1261_v63, %v324_v15 }
  0xab   : > { %v408_v46 = vadd.f32 %v404_v38, %v399_v32  ;;  %v433_v49 = vadd.f32 %v429_v42, %v424_v33  ;;  %v491_v9 = vunpack.c.l.b16 %v447_v58  ;;  %v383_v18 = vadd.f32 %v379_v60, %v374_v56 }
  0xac   : > { %v407_v50 = vadd.f32 %v403_v43, %v398_v28  ;;  %v432_v53 = vadd.f32 %v428_v47, %v423_v30  ;;  %v382_v16 = vadd.f32 %v378_v62, %v373_v52  ;;  %v422_v24 = vpack.c.bf16 %v418_v0, %v418_v0 }
  0xad   : > { %v437_v57 = vmul.f32 0.2, %v433_v49  ;;  %v412_v61 = vmul.f32 0.2, %v408_v46  ;;  %v493_v20 = vpack.c.b16 %v491_v9, %v490_v6  ;;  %v350_v28 = vmul.f32 %v1261_v63, %v1398_v8 }
  0xae   : > { %v411_v2 = vmul.f32 0.2, %v407_v50  ;;  %v436_v3 = vmul.f32 0.2, %v432_v53  ;;  %v360_v15 = vadd.f32 %v356_v5, %v351_v10  ;;  %v354_v30 = vmul.f32 %v1418_v27, %v332_v34 }
  0xaf   : > { %v441_v1 = vmax.f32 %v433_v49, %v437_v57  ;;  %v416_v19 = vmax.f32 %v408_v46, %v412_v61  ;;  %528 = vmatpush.bf16.msra.mxu0 %v493_v20  ;;  %1201 = vmatpush.bf16.msra.mxu1 %v493_v20  ;;  %v421_v32 = vpack.c.bf16 %v417_v4, %v417_v4  ;;  %v387_v35 = vmul.f32 0.2, %v383_v18 }
  0xb0   : > { %v440_v13 = vmax.f32 %v432_v53, %v436_v3  ;;  %v415_v21 = vmax.f32 %v407_v50, %v411_v2  ;;  %1202 = vmatpush.bf16.msra.mxu2 %v493_v20  ;;  %1203 = vmatpush.bf16.msra.mxu3 %v493_v20  ;;  %v393_v33 = vmax.f32 %v385_v55, %v389_v12  ;;  %v386_v37 = vmul.f32 0.2, %v382_v16  ;;  %v1158_v20 = vld [vmem:[%s1737_s2 + $0x18] sm:$0xff] }
  0xb1   : > { %v445_v17 = vpack.c.bf16 %v441_v1, %v441_v1  ;;  %v353_v36 = vmul.f32 %v1418_v27, %v328_v39  ;;  %v479_v7 = vunpack.c.l.b16 %v422_v24  ;;  %v420_v8 = vpack.c.bf16 %v416_v19, %v416_v19  ;;  %v1156_v19 = vld [vmem:[%s1737_s2 + $0x8] sm:$0xff] }
  0xb2   : > { %v444_v22 = vpack.c.bf16 %v440_v13, %v440_v13  ;;  %v419_v40 = vpack.c.bf16 %v415_v21, %v415_v21  ;;  %v359_v41 = vadd.f32 %v355_v25, %v350_v28  ;;  %v392_v42 = vmax.f32 %v384_v59, %v388_v14 }
  0xb3   : > { %v489_v23 = vunpack.c.l.b16 %v445_v17  ;;  %v358_v43 = vadd.f32 %v354_v30, %v349_v29  ;;  %v478_v34 = vunpack.c.l.b16 %v421_v32  ;;  %v364_v44 = vmul.f32 0.2, %v360_v15 }
  0xb4   : > { %v488_v31 = vunpack.c.l.b16 %v444_v22  ;;  %v391_v45 = vmax.f32 %v383_v18, %v387_v35  ;;  %v357_v46 = vadd.f32 %v353_v36, %v348_v26  ;;  %v390_v47 = vmax.f32 %v382_v16, %v386_v37  ;;  %v1155_v18 = vld [vmem:[%s1737_s2] sm:$0xff]  ;;  %v1157_v16 = vld [vmem:[%s1737_s2 + $0x10] sm:$0xff] }
  0xb5   : > { %v481_v27 = vpack.c.b16 %v479_v7, %v478_v34  ;;  %v476_v39 = vunpack.c.l.b16 %v419_v40  ;;  %v477_v48 = vunpack.c.l.b16 %v420_v8  ;;  %v397_v49 = vpack.c.bf16 %v393_v33, %v393_v33  ;;  %v580_v26 = vld [vmem:[#allocation2 + $0x10] sm:$0xff]  ;;  %v619_v34 = vld [vmem:[#allocation3] sm:$0xff] }
  0xb6   : > { %v492_v38 = vpack.c.b16 %v489_v23, %v488_v31  ;;  %v363_v50 = vmul.f32 0.2, %v359_v41  ;;  %v396_v11 = vpack.c.bf16 %v392_v42, %v392_v42  ;;  %v368_v51 = vmax.f32 %v360_v15, %v364_v44 }
  0xb7   : > { %v362_v52 = vmul.f32 0.2, %v358_v43  ;;  %v361_v53 = vmul.f32 0.2, %v357_v46  ;;  %v480_v54 = vpack.c.b16 %v477_v48, %v476_v39  ;;  %v467_v55 = vunpack.c.l.b16 %v397_v49  ;;  %v582_v39 = vld [vmem:[#allocation2 + $0x20] sm:$0xff] }
  0xb8   : > { %529 = vmatpush.bf16.msra.mxu0 %v492_v38  ;;  %1204 = vmatpush.bf16.msra.mxu1 %v492_v38  ;;  %v394_v56 = vpack.c.bf16 %v390_v47, %v390_v47  ;;  %v395_v57 = vpack.c.bf16 %v391_v45, %v391_v45  ;;  %v367_v58 = vmax.f32 %v359_v41, %v363_v50  ;;  %v466_v59 = vunpack.c.l.b16 %v396_v11  ;;  %v578_v41 = vld [vmem:[#allocation2] sm:$0xff]  ;;  %v579_v50 = vld [vmem:[#allocation2 + $0x8] sm:$0xff] }
  0xb9   : > { %1205 = vmatpush.bf16.msra.mxu2 %v492_v38  ;;  %1206 = vmatpush.bf16.msra.mxu3 %v492_v38  ;;  %v366_v60 = vmax.f32 %v358_v43, %v362_v52  ;;  %v365_v61 = vmax.f32 %v357_v46, %v361_v53  ;;  %v372_v1 = vpack.c.bf16 %v368_v51, %v368_v51 }
  0xba   : > { %v469_v62 = vpack.c.b16 %v467_v55, %v466_v59  ;;  %v464_v63 = vunpack.c.l.b16 %v394_v56  ;;  %v465_v0 = vunpack.c.l.b16 %v395_v57  ;;  %v371_v2 = vpack.c.bf16 %v367_v58, %v367_v58  ;;  %v584_v55 = vld [vmem:[#allocation2 + $0x30] sm:$0xff]  ;;  %v622_v58 = vld [vmem:[#allocation3 + $0x18] sm:$0xff] }
  0xbb   : > { %v455_v4 = vunpack.c.l.b16 %v372_v1  ;;  %v369_v5 = vpack.c.bf16 %v365_v61, %v365_v61  ;;  %v370_v6 = vpack.c.bf16 %v366_v60, %v366_v60 }
  0xbc   : > { %530 = vmatpush.bf16.msra.mxu0 %v481_v27  ;;  %1207 = vmatpush.bf16.msra.mxu1 %v481_v27  ;;  %v468_v3 = vpack.c.b16 %v465_v0, %v464_v63  ;;  %v454_v9 = vunpack.c.l.b16 %v371_v2  ;;  %v624_v63 = vld [vmem:[#allocation3 + $0x28] sm:$0xff]  ;;  %v581_v0 = vld [vmem:[#allocation2 + $0x18] sm:$0xff] }
  0xbd   : > { %1208 = vmatpush.bf16.msra.mxu2 %v481_v27  ;;  %1209 = vmatpush.bf16.msra.mxu3 %v481_v27  ;;  %v452_v12 = vunpack.c.l.b16 %v369_v5  ;;  %v453_v13 = vunpack.c.l.b16 %v370_v6  ;;  %v621_v27 = vld [vmem:[#allocation3 + $0x10] sm:$0xff] }
  0xbe   : > { %v457_v10 = vpack.c.b16 %v455_v4, %v454_v9 }
  0xbf   : > { %v456_v17 = vpack.c.b16 %v453_v13, %v452_v12  ;;  %v625_v13 = vld [vmem:[#allocation3 + $0x30] sm:$0xff] }
  0xc0   : > { %531 = vmatpush.bf16.msra.mxu0 %v480_v54  ;;  %1210 = vmatpush.bf16.msra.mxu1 %v480_v54 }
  0xc1   : > { %1211 = vmatpush.bf16.msra.mxu2 %v480_v54  ;;  %1212 = vmatpush.bf16.msra.mxu3 %v480_v54  ;;  %v585_v54 = vld [vmem:[#allocation2 + $0x38] sm:$0xff] }
  0xc4   : > { %532 = vmatpush.bf16.msra.mxu0 %v469_v62  ;;  %1213 = vmatpush.bf16.msra.mxu1 %v469_v62 }
  0xc5   : > { %1214 = vmatpush.bf16.msra.mxu2 %v469_v62  ;;  %1215 = vmatpush.bf16.msra.mxu3 %v469_v62 }
  0xc8   : > { %533 = vmatpush.bf16.msra.mxu0 %v468_v3  ;;  %1216 = vmatpush.bf16.msra.mxu1 %v468_v3 }
  0xc9   : > { %1217 = vmatpush.bf16.msra.mxu2 %v468_v3  ;;  %1218 = vmatpush.bf16.msra.mxu3 %v468_v3  ;;  %v583_v3 = vld [vmem:[#allocation2 + $0x28] sm:$0xff] }
  0xcc   : > { %534 = vmatpush.bf16.msra.mxu0 %v457_v10  ;;  %1219 = vmatpush.bf16.msra.mxu1 %v457_v10 }
  0xcd   : > { %1220 = vmatpush.bf16.msra.mxu2 %v457_v10  ;;  %1221 = vmatpush.bf16.msra.mxu3 %v457_v10  ;;  %v623_v10 = vld [vmem:[#allocation3 + $0x20] sm:$0xff] }
  0xd0   : > { %535 = vmatpush.bf16.msra.mxu0 %v456_v17  ;;  %1222 = vmatpush.bf16.msra.mxu1 %v456_v17 }
  0xd1   : > { %1223 = vmatpush.bf16.msra.mxu2 %v456_v17  ;;  %1224 = vmatpush.bf16.msra.mxu3 %v456_v17 }
  0xd3   : > { %536 = vmatmul.bf16.vlgmr.msra.gmra.mxu0 %v1155_v18  ;;  %541 = vmatmul.bf16.vlgmr.msra.gmra.mxu1 %v1156_v19 }
  0xd4   : > { %546 = vmatmul.bf16.vlgmr.msra.gmra.mxu2 %v1157_v16  ;;  %551 = vmatmul.bf16.vlgmr.msra.gmra.mxu3 %v1158_v20  ;;  %v620_v16 = vld [vmem:[#allocation3 + $0x8] sm:$0xff] }
 0x150   : > { %v537_v21 = vpop.f32.mrf.mxu0  ;;  %v542_v22 = vpop.f32.mrf.mxu1 }
 0x151   : > { %590 = vadd.xlane.f32.xlu0 %v542_v22  ;;  %586 = vadd.xlane.f32.xlu2 %v537_v21  ;;  %v627_v23 = vmul.f32 %v537_v21, %v537_v21  ;;  %v629_v24 = vmul.f32 %v542_v22, %v542_v22 }
 0x153   : > { %635 = vadd.xlane.f32.xlu1 %v627_v23 }
 0x157   : > { %v547_v25 = vpop.f32.mrf.mxu2  ;;  %v552_v28 = vpop.f32.mrf.mxu3 }
 0x158   : > { %v539_v14 = vpop.f32.mrf.mxu0  ;;  %v544_v29 = vpop.f32.mrf.mxu1  ;;  %v631_v38 = vmul.f32 %v547_v25, %v547_v25  ;;  %v633_v7 = vmul.f32 %v552_v28, %v552_v28 }
 0x159   : > { %v1162_v15 = vpack.c.bf16 %v539_v14, %v537_v21  ;;  %639 = vadd.xlane.f32.xlu0 %v629_v24  ;;  %594 = vadd.xlane.f32.xlu2 %v547_v25  ;;  %v1167_v30 = vpack.c.bf16 %v544_v29, %v542_v22  ;;  %v630_v33 = vmul.f32 %v544_v29, %v544_v29  ;;  %v626_v22 = vld [vmem:[#allocation3 + $0x38] sm:$0xff] }
 0x15a   : > { %v628_v40 = vmul.f32 %v539_v14, %v539_v14 }
 0x15b   : > { %1163 = vst [vmem:[#allocation4 + $0x10] sm:$0xff] %v1162_v15   ;;  %588 = vadd.xlane.f32.xlu1 %v539_v14 }
 0x15c   : > { %1195 = vst [vmem:[#allocation4] sm:$0xff] %v1167_v30  }
 0x15f   : > { %v549_v31 = vpop.f32.mrf.mxu2  ;;  %v554_v32 = vpop.f32.mrf.mxu3 }
 0x160   : > { %v1172_v35 = vpack.c.bf16 %v549_v31, %v547_v25  ;;  %v1177_v36 = vpack.c.bf16 %v554_v32, %v552_v28  ;;  %v632_v37 = vmul.f32 %v549_v31, %v549_v31  ;;  %v634_v8 = vmul.f32 %v554_v32, %v554_v32 }
 0x161   : > { %600 = vadd.xlane.f32.xlu0 %v554_v32  ;;  %598 = vadd.xlane.f32.xlu2 %v552_v28 }
 0x162   : > { %1196 = vst [vmem:[#allocation4 + $0x18] sm:$0xff] %v1172_v35  }
 0x163   : > { %1197 = vst [vmem:[#allocation4 + $0x8] sm:$0xff] %v1177_v36   ;;  %641 = vadd.xlane.f32.xlu1 %v630_v33 }
 0x169   : > { %645 = vadd.xlane.f32.xlu0 %v632_v37  ;;  %592 = vadd.xlane.f32.xlu2 %v544_v29 }
 0x16b   : > { %596 = vadd.xlane.f32.xlu1 %v549_v31 }
 0x171   : > { %643 = vadd.xlane.f32.xlu2 %v631_v38 }
 0x173   : > { %647 = vadd.xlane.f32.xlu1 %v633_v7 }
 0x179   : > { %637 = vadd.xlane.f32.xlu2 %v628_v40 }
 0x181   : > { %649 = vadd.xlane.f32.xlu2 %v634_v8 }
 0x1c4   : > { %v591_v42 = vpop.xlane.xlu0 %590  ;;  %v587_v43 = vpop.xlane.xlu2 %586 }
 0x1c5   : > { %v604_v44 = vadd.f32 %v591_v42, %v580_v26  ;;  %v602_v45 = vadd.f32 %v587_v43, %v578_v41 }
 0x1c6   : > { %v636_v46 = vpop.xlane.xlu1 %635 }
 0x1c7   : > { %613 = vst.msk [vmem:[#allocation2 + $0x10] sm:$0xff] %vm610_vm1, %v604_v44  ;;  %v651_v47 = vadd.f32 %v636_v46, %v619_v34 }
 0x1c8   : > { %611 = vst.msk [vmem:[#allocation2] sm:$0xff] %vm610_vm1, %v602_v45 }
 0x1c9   : > { %659 = vst.msk [vmem:[#allocation3] sm:$0xff] %vm610_vm1, %v651_v47 }
 0x1cc   : > { %v640_v48 = vpop.xlane.xlu0 %639  ;;  %v595_v49 = vpop.xlane.xlu2 %594 }
 0x1cd   : > { %v653_v11 = vadd.f32 %v640_v48, %v621_v27  ;;  %v606_v51 = vadd.f32 %v595_v49, %v582_v39 }
 0x1ce   : > { %v589_v52 = vpop.xlane.xlu1 %588 }
 0x1cf   : > { %661 = vst.msk [vmem:[#allocation3 + $0x10] sm:$0xff] %vm610_vm1, %v653_v11  ;;  %v603_v53 = vadd.f32 %v589_v52, %v579_v50 }
 0x1d0   : > { %615 = vst.msk [vmem:[#allocation2 + $0x20] sm:$0xff] %vm610_vm1, %v606_v51 }
 0x1d1   : > { %612 = vst.msk [vmem:[#allocation2 + $0x8] sm:$0xff] %vm610_vm1, %v603_v53 }
 0x1d4   : > { %v601_v56 = vpop.xlane.xlu0 %600  ;;  %v599_v57 = vpop.xlane.xlu2 %598 }
 0x1d5   : > { %v609_v59 = vadd.f32 %v601_v56, %v585_v54  ;;  %v608_v60 = vadd.f32 %v599_v57, %v584_v55 }
 0x1d6   : > { %v642_v61 = vpop.xlane.xlu1 %641 }
 0x1d7   : > { %618 = vst.msk [vmem:[#allocation2 + $0x38] sm:$0xff] %vm610_vm1, %v609_v59  ;;  %v654_v62 = vadd.f32 %v642_v61, %v622_v58 }
 0x1d8   : > { %617 = vst.msk [vmem:[#allocation2 + $0x30] sm:$0xff] %vm610_vm1, %v608_v60 }
 0x1d9   : > { %662 = vst.msk [vmem:[#allocation3 + $0x18] sm:$0xff] %vm610_vm1, %v654_v62 }
 0x1dc   : > { %v646_v1 = vpop.xlane.xlu0 %645  ;;  %v593_v2 = vpop.xlane.xlu2 %592 }
 0x1dd   : > { %v656_v4 = vadd.f32 %v646_v1, %v624_v63  ;;  %v605_v5 = vadd.f32 %v593_v2, %v581_v0 }
 0x1de   : > { %v597_v6 = vpop.xlane.xlu1 %596 }
 0x1df   : > { %664 = vst.msk [vmem:[#allocation3 + $0x28] sm:$0xff] %vm610_vm1, %v656_v4  ;;  %v607_v9 = vadd.f32 %v597_v6, %v583_v3 }
 0x1e0   : > { %614 = vst.msk [vmem:[#allocation2 + $0x18] sm:$0xff] %vm610_vm1, %v605_v5 }
 0x1e1   : > { %616 = vst.msk [vmem:[#allocation2 + $0x28] sm:$0xff] %vm610_vm1, %v607_v9 }
 0x1e4   : > { %v644_v12 = vpop.xlane.xlu2 %643 }
 0x1e5   : > { %v655_v17 = vadd.f32 %v644_v12, %v623_v10 }
 0x1e6   : > { %v648_v18 = vpop.xlane.xlu1 %647 }
 0x1e7   : > { %663 = vst.msk [vmem:[#allocation3 + $0x20] sm:$0xff] %vm610_vm1, %v655_v17  ;;  %v657_v19 = vadd.f32 %v648_v18, %v625_v13 }
 0x1e9   : > { %665 = vst.msk [vmem:[#allocation3 + $0x30] sm:$0xff] %vm610_vm1, %v657_v19 }
 0x1ec   : > { %v638_v20 = vpop.xlane.xlu2 %637 }
 0x1ed   : > { %v652_v21 = vadd.f32 %v638_v20, %v620_v16 }
 0x1ef   : > { %660 = vst.msk [vmem:[#allocation3 + $0x8] sm:$0xff] %vm610_vm1, %v652_v21 }
 0x1f4   : > { %v650_v23 = vpop.xlane.xlu2 %649 }
 0x1f5   : > { %v658_v24 = vadd.f32 %v650_v23, %v626_v22 }
 0x1f7   : > { %666 = vst.msk [vmem:[#allocation3 + $0x38] sm:$0xff] %vm610_vm1, %v658_v24 }
 0x1f8 PF: > { %p1149_p6 = scmp.ne.s32.totalorder %s1297_s21, 1 }
 0x1fa   : > { %670 = sbr.rel (%p1149_p6) target bundleno = 750 (0x2ee), region = 56 }
 0x1ff   : > { %v989_v25 = vld [vmem:[%s1740_s5 + $0x8] sm:$0xff]  ;;  %v988_v28 = vld [vmem:[%s1740_s5] sm:$0xff]  ;;  %v1310_v29 = vmov 0   ;;  %v694_v31 = vld [vmem:[#allocation2 + $0x10] sm:$0xff] }
 0x200   : > { %v696_v14 = vld [vmem:[#allocation2 + $0x20] sm:$0xff]  ;;  %1263 = vset.pattern.permute.xlu2 %v1310_v29  ;;  %1262 = vset.pattern.permute.xlu1 %v1310_v29  ;;  %v1476_v33 = vmul.f32 0.055555556, %v694_v31  ;;  %v710_v35 = vld [vmem:[#allocation3 + $0x10] sm:$0xff]  ;;  %v697_v41 = vld [vmem:[#allocation2 + $0x28] sm:$0xff] }
 0x201   : > { %v1474_v15 = vmul.f32 0.055555556, %v696_v14  ;;  %v712_v30 = vld [vmem:[#allocation3 + $0x20] sm:$0xff]  ;;  %1003 = vperm.xlu2 %1263, %v989_v25   ;;  %998 = vperm.xlu1 %1262, %v988_v28   ;;  %v718_v37 = vmul.f32 0.055555556, %v710_v35  ;;  %v713_v42 = vld [vmem:[#allocation3 + $0x28] sm:$0xff] }
 0x202   : > { %v720_v32 = vmul.f32 0.055555556, %v712_v30  ;;  %1264 = vset.pattern.permute.xlu0 %v1310_v29  ;;  %v692_v38 = vld [vmem:[#allocation2] sm:$0xff]  ;;  %v726_v40 = vmul.f32 %v1476_v33, %v1476_v33  ;;  %v1484_v34 = vmul.f32 0.055555556, %v697_v41  ;;  %v695_v45 = vld [vmem:[#allocation2 + $0x18] sm:$0xff] }
 0x203   : > { %v728_v36 = vmul.f32 %v1474_v15, %v1474_v15  ;;  %v708_v7 = vld [vmem:[#allocation3] sm:$0xff]  ;;  %v1482_v8 = vmul.f32 0.055555556, %v692_v38  ;;  %v721_v44 = vmul.f32 0.055555556, %v713_v42  ;;  %v711_v39 = vld [vmem:[#allocation3 + $0x18] sm:$0xff] }
 0x204   : > { %v716_v26 = vmul.f32 0.055555556, %v708_v7  ;;  %v734_v46 = vsub.f32 %v718_v37, %v726_v40  ;;  %v1488_v27 = vmul.f32 0.055555556, %v695_v45  ;;  %v693_v48 = vld [vmem:[#allocation2 + $0x8] sm:$0xff]  ;;  %v729_v11 = vmul.f32 %v1484_v34, %v1484_v34  ;;  %v699_v57 = vld [vmem:[#allocation2 + $0x38] sm:$0xff] }
 0x205   : > { %v736_v43 = vsub.f32 %v720_v32, %v728_v36  ;;  %v724_v47 = vmul.f32 %v1482_v8, %v1482_v8  ;;  %v709_v49 = vld [vmem:[#allocation3 + $0x8] sm:$0xff]  ;;  %v719_v51 = vmul.f32 0.055555556, %v711_v39  ;;  %v1492_v52 = vmul.f32 0.055555556, %v693_v48  ;;  %v715_v58 = vld [vmem:[#allocation3 + $0x38] sm:$0xff] }
 0x206   : > { %v742_v53 = vmax.f32 %v734_v46, 0.0  ;;  %v727_v55 = vmul.f32 %v1488_v27, %v1488_v27  ;;  %v717_v56 = vmul.f32 0.055555556, %v709_v49  ;;  %v737_v60 = vsub.f32 %v721_v44, %v729_v11  ;;  %v698_v2 = vld [vmem:[#allocation2 + $0x30] sm:$0xff]  ;;  %v843_v39 = vld [vmem:[%s1738_s3 + $0x38] sm:$0xff] }
 0x207   : > { %v744_v50 = vmax.f32 %v736_v43, 0.0  ;;  %v732_v54 = vsub.f32 %v716_v26, %v724_v47  ;;  %v725_v61 = vmul.f32 %v1492_v52, %v1492_v52  ;;  %v1500_v62 = vmul.f32 0.055555556, %v699_v57  ;;  %v714_v6 = vld [vmem:[#allocation3 + $0x30] sm:$0xff] }
 0x208   : > { %v1502_v63 = vadd.f32 1e-05, %v742_v53  ;;  %v735_v1 = vsub.f32 %v719_v51, %v727_v55  ;;  %v745_v3 = vmax.f32 %v737_v60, 0.0  ;;  %v723_v5 = vmul.f32 0.055555556, %v715_v58  ;;  %v840_v53 = vld [vmem:[%s1738_s3 + $0x20] sm:$0xff] }
 0x209   : > { %v1496_v59 = vadd.f32 1e-05, %v744_v50  ;;  %v740_v0 = vmax.f32 %v732_v54, 0.0  ;;  %v733_v4 = vsub.f32 %v717_v56, %v725_v61  ;;  %v731_v17 = vmul.f32 %v1500_v62, %v1500_v62 }
 0x20a   : > { %v743_v10 = vmax.f32 %v735_v1, 0.0  ;;  %v1508_v12 = vadd.f32 1e-05, %v745_v3  ;;  %v1512_v18 = vmul.f32 0.055555556, %v698_v2  ;;  %vm782_vm3 = vweird.f32 %v1502_v63 }
 0x20b   : > { %1265 = vrsqrt.f32 %v1496_v59  ;;  %v1506_v9 = vadd.f32 1e-05, %v740_v0  ;;  %v741_v13 = vmax.f32 %v733_v4, 0.0  ;;  %v722_v16 = vmul.f32 0.055555556, %v714_v6 }
 0x20c   : > { %1267 = vrsqrt.f32 %v1502_v63  ;;  %v1515_v19 = vadd.f32 1e-05, %v743_v10  ;;  %v739_v21 = vsub.f32 %v723_v5, %v731_v17  ;;  %v730_v22 = vmul.f32 %v1512_v18, %v1512_v18 }
 0x20d   : > { %1269 = vrsqrt.f32 %v1506_v9  ;;  %v1518_v20 = vadd.f32 1e-05, %v741_v13  ;;  %vm802_vm2 = vweird.f32 %v1496_v59  ;;  %vm762_vm4 = vweird.f32 %v1506_v9 }
 0x20e   : > { %1271 = vrsqrt.f32 %v1508_v12  ;;  %v747_v24 = vmax.f32 %v739_v21, 0.0  ;;  %v738_v14 = vsub.f32 %v722_v16, %v730_v22  ;;  %vm812_vm6 = vweird.f32 %v1508_v12 }
 0x20f   : > { %1273 = vrsqrt.f32 %v1515_v19  ;;  %vm792_vm7 = vweird.f32 %v1515_v19  ;;  %vm772_vm8 = vweird.f32 %v1518_v20 }
 0x210   : > { %1275 = vrsqrt.f32 %v1518_v20  ;;  %v1529_v30 = vadd.f32 1e-05, %v747_v24  ;;  %v746_v38 = vmax.f32 %v738_v14, 0.0 }
 0x211   : > { %v1266_v23 = vpop.eup %1265 }
 0x212   : > { %v1268_v25 = vpop.eup %1267  ;;  %v797_v28 = vmul.f32 %v1266_v23, %v1496_v59  ;;  %vm803_vm5 = vweird.f32 %v1266_v23  ;;  %1277 = vrsqrt.f32 %v1529_v30  ;;  %v1564_v11 = vadd.f32 1e-05, %v746_v38  ;;  %v838_v59 = vld [vmem:[%s1738_s3 + $0x10] sm:$0xff] }
 0x213   : > { %v777_v29 = vmul.f32 %v1268_v25, %v1502_v63  ;;  %v1531_v31 = vpop.eup %1269  ;;  %vm783_vm9 = vweird.f32 %v1268_v25  ;;  %vm1559_vm13 = vmor %vm802_vm2, %vm803_vm5 }
 0x214   : > { %v798_v32 = vmul.f32 %v1266_v23, %v797_v28  ;;  %v1535_v35 = vpop.eup %1271  ;;  %v757_v37 = vmul.f32 %v1531_v31, %v1506_v9  ;;  %vm763_vm10 = vweird.f32 %v1531_v31  ;;  %vm1572_vm14 = vmor %vm782_vm3, %vm783_vm9  ;;  %1279 = vrsqrt.f32 %v1564_v11  ;;  %v836_v9 = vld [vmem:[%s1738_s3] sm:$0xff]  ;;  %v841_v28 = vld [vmem:[%s1738_s3 + $0x28] sm:$0xff] }
 0x215   : > { %v778_v36 = vmul.f32 %v1268_v25, %v777_v29  ;;  %v1541_v7 = vpop.eup %1273  ;;  %v807_v26 = vmul.f32 %v1535_v35, %v1508_v12  ;;  %vm813_vm11 = vweird.f32 %v1535_v35  ;;  %vm1590_vm0 = vmor %vm762_vm4, %vm763_vm10  ;;  %vm832_vm4 = vweird.f32 %v1529_v30 }
 0x216   : > { %v799_v40 = vmul.f32 0.5, %v798_v32  ;;  %v1546_v41 = vpop.eup %1275  ;;  %v758_v43 = vmul.f32 %v1531_v31, %v757_v37  ;;  %v787_v44 = vmul.f32 %v1541_v7, %v1515_v19  ;;  %vm793_vm12 = vweird.f32 %v1541_v7  ;;  %vm1608_vm1 = vmor %vm812_vm6, %vm813_vm11 }
 0x217   : > { %v779_v42 = vmul.f32 0.5, %v778_v36  ;;  %v808_v46 = vmul.f32 %v1535_v35, %v807_v26  ;;  %v767_v47 = vmul.f32 %v1546_v41, %v1518_v20  ;;  %vm773_vm15 = vweird.f32 %v1546_v41  ;;  %vm1617_vm2 = vmor %vm792_vm7, %vm793_vm12  ;;  %v839_v36 = vld [vmem:[%s1738_s3 + $0x18] sm:$0xff] }
 0x218   : > { %v800_v45 = vsub.f32 1.5, %v799_v40  ;;  %v759_v49 = vmul.f32 0.5, %v758_v43  ;;  %v788_v50 = vmul.f32 %v1541_v7, %v787_v44  ;;  %v1578_v57 = vpop.eup %1277  ;;  %vm1638_vm3 = vmor %vm772_vm8, %vm773_vm15  ;;  %v837_v40 = vld [vmem:[%s1738_s3 + $0x8] sm:$0xff]  ;;  %vm822_vm7 = vweird.f32 %v1564_v11 }
 0x219   : > { %v780_v48 = vsub.f32 1.5, %v779_v42  ;;  %v809_v55 = vmul.f32 0.5, %v808_v46  ;;  %v768_v56 = vmul.f32 %v1546_v41, %v767_v47  ;;  %v827_v3 = vmul.f32 %v1578_v57, %v1529_v30  ;;  %v852_v46 = vld [vmem:[%s1739_s4] sm:$0xff] }
 0x21a   : > { %v801_v51 = vmul.f32 %v1266_v23, %v800_v45  ;;  %v760_v60 = vsub.f32 1.5, %v759_v49  ;;  %v789_v61 = vmul.f32 0.5, %v788_v50  ;;  %v1280_v32 = vpop.eup %1279  ;;  %vm833_vm5 = vweird.f32 %v1578_v57  ;;  %v842_v49 = vld [vmem:[%s1738_s3 + $0x30] sm:$0xff] }
 0x21b   : > { %v781_v58 = vmul.f32 %v1268_v25, %v780_v48  ;;  %v810_v1 = vsub.f32 1.5, %v809_v55  ;;  %v769_v2 = vmul.f32 0.5, %v768_v56  ;;  %vm1658_vm6 = vmor %vm832_vm4, %vm833_vm5  ;;  %vm823_vm8 = vweird.f32 %v1280_v32  ;;  %v855_v56 = vld [vmem:[%s1739_s4 + $0x18] sm:$0xff] }
 0x21c   : > { %v805_v63 = vsel %vm1559_vm13, %v1266_v23, %v801_v51  ;;  %v761_v6 = vmul.f32 %v1531_v31, %v760_v60  ;;  %v790_v13 = vsub.f32 1.5, %v789_v61  ;;  %v828_v23 = vmul.f32 %v1578_v57, %v827_v3  ;;  %vm824_vm9 = vmor %vm822_vm7, %vm823_vm8 }
 0x21d   : > { %v1596_v4 = vmul.f32 %v840_v53, %v805_v63  ;;  %v785_v5 = vsel %vm1572_vm14, %v1268_v25, %v781_v58  ;;  %v811_v16 = vmul.f32 %v1535_v35, %v810_v1  ;;  %v770_v22 = vsub.f32 1.5, %v769_v2  ;;  %v858_v63 = vld [vmem:[%s1739_s4 + $0x30] sm:$0xff] }
 0x21e   : > { %v846_v17 = vmul.f32 %v838_v59, %v785_v5  ;;  %v765_v12 = vsel %vm1590_vm0, %v1531_v31, %v761_v6  ;;  %v791_v24 = vmul.f32 %v1541_v7, %v790_v13  ;;  %v829_v31 = vmul.f32 0.5, %v828_v23  ;;  %v853_v59 = vld [vmem:[%s1739_s4 + $0x8] sm:$0xff]  ;;  %v990_v2 = vld [vmem:[%s1740_s5 + $0x10] sm:$0xff]  ;;  %v859_v5 = vld [vmem:[%s1739_s4 + $0x38] sm:$0xff] }
 0x21f   : > { %898 = vperm.xlu2 %1263, %v1596_v4   ;;  %v844_v25 = vmul.f32 %v836_v9, %v765_v12  ;;  %v815_v19 = vsel %vm1608_vm1, %v1535_v35, %v811_v16  ;;  %v771_v14 = vmul.f32 %v1546_v41, %v770_v22  ;;  %v864_v0 = vmul.f32 %v1596_v4, %v1474_v15  ;;  %v857_v4 = vld [vmem:[%s1739_s4 + $0x28] sm:$0xff]  ;;  %v992_v9 = vld [vmem:[%s1740_s5 + $0x20] sm:$0xff]  ;;  %v991_v13 = vld [vmem:[%s1740_s5 + $0x18] sm:$0xff] }
 0x220   : > { %888 = vperm.xlu1 %1262, %v846_v17   ;;  %v795_v35 = vsel %vm1617_vm2, %v1541_v7, %v791_v24  ;;  %v830_v37 = vsub.f32 1.5, %v829_v31  ;;  %v849_v38 = vmul.f32 %v841_v28, %v815_v19  ;;  %v817_v7 = vmul.f32 %v1280_v32, %v1564_v11  ;;  %v1180_v31 = vld [vmem:[#allocation4 + $0x10] sm:$0xff]  }
 0x221   : > { %878 = vperm.xlu0 %1264, %v844_v25   ;;  %v775_v20 = vsel %vm1638_vm3, %v1546_v41, %v771_v14  ;;  %v847_v26 = vmul.f32 %v839_v36, %v795_v35  ;;  %v860_v45 = vmul.f32 %v844_v25, %v1482_v8  ;;  %v862_v55 = vmul.f32 %v846_v17, %v1476_v33  ;;  %v993_v17 = vld [vmem:[%s1740_s5 + $0x28] sm:$0xff] }
 0x222   : > { %v831_v42 = vmul.f32 %v1578_v57, %v830_v37  ;;  %v818_v43 = vmul.f32 %v1280_v32, %v817_v7  ;;  %v845_v44 = vmul.f32 %v837_v40, %v775_v20  ;;  %v865_v15 = vmul.f32 %v849_v38, %v1484_v34  ;;  %v994_v34 = vld [vmem:[%s1740_s5 + $0x30] sm:$0xff] }
 0x223   : > { %v868_v50 = vsub.f32 %v852_v46, %v860_v45  ;;  %v863_v54 = vmul.f32 %v847_v26, %v1488_v27  ;;  %v1181_v35 = vunpack.c.l.bf16 %v1180_v31  ;;  %v1182_v36 = vunpack.c.h.bf16 %v1180_v31  ;;  %v1199_v45 = vld [vmem:[#allocation4 + $0x18] sm:$0xff]  }
 0x224   : > { %v819_v41 = vmul.f32 0.5, %v818_v43  ;;  %v835_v47 = vsel %vm1658_vm6, %v1578_v57, %v831_v42  ;;  %v854_v57 = vld [vmem:[%s1739_s4 + $0x10] sm:$0xff]  ;;  %v861_v58 = vmul.f32 %v845_v44, %v1492_v52  ;;  %v856_v52 = vld [vmem:[%s1739_s4 + $0x20] sm:$0xff]  ;;  %v873_v10 = vsub.f32 %v857_v4, %v865_v15 }
 0x225   : > { %v851_v11 = vmul.f32 %v843_v39, %v835_v47  ;;  %v871_v60 = vsub.f32 %v855_v56, %v863_v54  ;;  %v870_v27 = vsub.f32 %v854_v57, %v862_v55  ;;  %v872_v3 = vsub.f32 %v856_v52, %v864_v0 }
 0x226   : > { %v820_v48 = vsub.f32 1.5, %v819_v41  ;;  %v869_v61 = vsub.f32 %v853_v59, %v861_v58 }
 0x227   : > { %903 = vperm.xlu2 %1263, %v849_v38   ;;  %v1198_v38 = vld [vmem:[#allocation4] sm:$0xff]  }
 0x228   : > { %893 = vperm.xlu1 %1262, %v847_v26   ;;  %v821_v8 = vmul.f32 %v1280_v32, %v820_v48  ;;  %v1186_v26 = vunpack.c.h.bf16 %v1198_v38  ;;  %v1185_v42 = vunpack.c.l.bf16 %v1198_v38  ;;  %v1189_v48 = vunpack.c.l.bf16 %v1199_v45 }
 0x229   : > { %883 = vperm.xlu0 %1264, %v845_v44  }
 0x22a   : > { %v825_v51 = vsel %vm824_vm9, %v1280_v32, %v821_v8 }
 0x22b   : > { %v850_v53 = vmul.f32 %v842_v49, %v825_v51 }
 0x22d   : > { %v866_v33 = vmul.f32 %v850_v53, %v1512_v18  ;;  %v867_v18 = vmul.f32 %v851_v11, %v1500_v62  ;;  %v995_v62 = vld [vmem:[%s1740_s5 + $0x38] sm:$0xff] }
 0x22f   : > { %926 = vperm.xlu2 %1263, %v868_v50   ;;  %v874_v1 = vsub.f32 %v858_v63, %v866_v33  ;;  %v875_v6 = vsub.f32 %v859_v5, %v867_v18 }
 0x230   : > { %913 = vperm.xlu1 %1262, %v851_v11   ;;  %v1200_v11 = vld [vmem:[#allocation4 + $0x8] sm:$0xff]  }
 0x231   : > { %908 = vperm.xlu0 %1264, %v850_v53   ;;  %v1190_v53 = vunpack.c.h.bf16 %v1199_v45  ;;  %v1193_v58 = vunpack.c.l.bf16 %v1200_v11 }
 0x237   : > { %941 = vperm.xlu2 %1263, %v871_v60   ;;  %v1194_v60 = vunpack.c.h.bf16 %v1200_v11 }
 0x238   : > { %936 = vperm.xlu1 %1262, %v870_v27  }
 0x239   : > { %931 = vperm.xlu0 %1264, %v869_v61  }
 0x23f   : > { %956 = vperm.xlu2 %1263, %v874_v1  }
 0x240   : > { %1008 = vperm.xlu1 %1262, %v990_v2  }
 0x241   : > { %946 = vperm.xlu0 %1264, %v872_v3  }
 0x247   : > { %1018 = vperm.xlu2 %1263, %v992_v9  }
 0x248   : > { %961 = vperm.xlu1 %1262, %v875_v6  }
 0x249   : > { %951 = vperm.xlu0 %1264, %v873_v10  }
 0x24f   : > { %1033 = vperm.xlu2 %1263, %v995_v62  }
 0x250   : > { %1028 = vperm.xlu1 %1262, %v994_v34  }
 0x251   : > { %1013 = vperm.xlu0 %1264, %v991_v13  }
 0x259   : > { %1023 = vperm.xlu0 %1264, %v993_v17  }
 0x25b   : > { %v1004_v21 = vpop.permute.xlu2 %1003 }
 0x273   : > { %v999_v16 = vpop.permute.xlu1 %998 }
 0x279   : > { %v899_v23 = vpop.permute.xlu2 %898 }
 0x27a   : > { %v920_v56 = vmul.f32 %v1189_v48, %v899_v23 }
 0x281   : > { %v904_v19 = vpop.permute.xlu2 %903 }
 0x282   : > { %v921_v63 = vmul.f32 %v1190_v53, %v904_v19 }
 0x289   : > { %v927_v29 = vpop.permute.xlu2 %926 }
 0x291   : > { %v942_v7 = vpop.permute.xlu2 %941 }
 0x292   : > { %v889_v22 = vpop.permute.xlu1 %888 }
 0x293   : > { %v879_v12 = vpop.permute.xlu0 %878  ;;  %v918_v46 = vmul.f32 %v1185_v42, %v889_v22 }
 0x294   : > { %v916_v20 = vmul.f32 %v1181_v35, %v879_v12 }
 0x296   : > { %v964_v30 = vadd.f32 %v927_v29, %v916_v20 }
 0x298   : > { %v972_v8 = vmul.f32 0.2, %v964_v30 }
 0x299   : > { %v957_v54 = vpop.permute.xlu2 %956 }
 0x29a   : > { %v894_v24 = vpop.permute.xlu1 %893  ;;  %v980_v57 = vmax.f32 %v964_v30, %v972_v8 }
 0x29b   : > { %v884_v25 = vpop.permute.xlu0 %883  ;;  %v919_v41 = vmul.f32 %v1186_v26, %v894_v24 }
 0x29c   : > { %v917_v40 = vmul.f32 %v1182_v36, %v884_v25  ;;  %v1036_v1 = vmul.f32 %v999_v16, %v980_v57 }
 0x29d   : > { %v967_v50 = vadd.f32 %v942_v7, %v919_v41 }
 0x29f   : > { %v975_v27 = vmul.f32 0.2, %v967_v50 }
 0x2a1   : > { %v983_v18 = vmax.f32 %v967_v50, %v975_v27  ;;  %v1019_v13 = vpop.permute.xlu2 %1018 }
 0x2a2   : > { %v914_v28 = vpop.permute.xlu1 %913 }
 0x2a3   : > { %v909_v14 = vpop.permute.xlu0 %908  ;;  %v923_v2 = vmul.f32 %v1194_v60, %v914_v28 }
 0x2a4   : > { %v922_v0 = vmul.f32 %v1193_v58, %v909_v14 }
 0x2a6   : > { %v970_v10 = vadd.f32 %v957_v54, %v922_v0 }
 0x2a8   : > { %v978_v12 = vmul.f32 0.2, %v970_v10 }
 0x2aa   : > { %v937_v37 = vpop.permute.xlu1 %936  ;;  %v986_v29 = vmax.f32 %v970_v10, %v978_v12 }
 0x2ab   : > { %v932_v32 = vpop.permute.xlu0 %931  ;;  %v966_v49 = vadd.f32 %v937_v37, %v918_v46  ;;  %v1034_v37 = vpop.permute.xlu2 %1033 }
 0x2ac   : > { %v965_v43 = vadd.f32 %v932_v32, %v917_v40 }
 0x2ad   : > { %v974_v59 = vmul.f32 0.2, %v966_v49 }
 0x2ae   : > { %v973_v47 = vmul.f32 0.2, %v965_v43 }
 0x2af   : > { %v982_v52 = vmax.f32 %v966_v49, %v974_v59 }
 0x2b0   : > { %v981_v51 = vmax.f32 %v965_v43, %v973_v47 }
 0x2b2   : > { %v1009_v39 = vpop.permute.xlu1 %1008  ;;  %v1037_v61 = vmul.f32 %v1004_v21, %v981_v51 }
 0x2b3   : > { %v947_v44 = vpop.permute.xlu0 %946  ;;  %v1038_v5 = vmul.f32 %v1009_v39, %v982_v52 }
 0x2b4   : > { %v968_v33 = vadd.f32 %v947_v44, %v920_v56  ;;  %v1044_v15 = vadd.f32 %v1037_v61, %v1036_v1 }
 0x2b6   : > { %v976_v4 = vmul.f32 0.2, %v968_v33  ;;  %v1045_v17 = vadd.f32 %v1044_v15, %v1038_v5 }
 0x2b8   : > { %v984_v22 = vmax.f32 %v968_v33, %v976_v4 }
 0x2ba   : > { %v962_v3 = vpop.permute.xlu1 %961  ;;  %v1040_v25 = vmul.f32 %v1019_v13, %v984_v22 }
 0x2bb   : > { %v952_v55 = vpop.permute.xlu0 %951  ;;  %v971_v62 = vadd.f32 %v962_v3, %v923_v2 }
 0x2bc   : > { %v969_v6 = vadd.f32 %v952_v55, %v921_v63 }
 0x2bd   : > { %v979_v23 = vmul.f32 0.2, %v971_v62 }
 0x2be   : > { %v977_v21 = vmul.f32 0.2, %v969_v6 }
 0x2bf   : > { %v987_v14 = vmax.f32 %v971_v62, %v979_v23 }
 0x2c0   : > { %v985_v16 = vmax.f32 %v969_v6, %v977_v21 }
 0x2c1   : > { %v1043_v38 = vmul.f32 %v1034_v37, %v987_v14 }
 0x2c2   : > { %v1029_v19 = vpop.permute.xlu1 %1028 }
 0x2c3   : > { %v1014_v9 = vpop.permute.xlu0 %1013  ;;  %v1042_v35 = vmul.f32 %v1029_v19, %v986_v29 }
 0x2c4   : > { %v1039_v34 = vmul.f32 %v1014_v9, %v983_v18 }
 0x2c6   : > { %v1046_v24 = vadd.f32 %v1045_v17, %v1039_v34 }
 0x2c8   : > { %v1047_v32 = vadd.f32 %v1046_v24, %v1040_v25 }
 0x2cb   : > { %v1024_v28 = vpop.permute.xlu0 %1023 }
 0x2cc   : > { %v1041_v31 = vmul.f32 %v1024_v28, %v985_v16 }
 0x2ce   : > { %v1048_v36 = vadd.f32 %v1047_v32, %v1041_v31 }
 0x2d0   : > { %v1049_v20 = vadd.f32 %v1048_v36, %v1042_v35 }
 0x2d2   : > { %v1050_v40 = vadd.f32 %v1049_v20, %v1043_v38 }
 0x2d4   : > { %v1051_v7 = vrot.slane %v1050_v40, 4 }
 0x2d6   : > { %v1052_v26 = vadd.f32 %v1051_v7, %v1050_v40 }
 0x2d8   : > { %v1053_v42 = vrot.slane %v1052_v26, 2 }
 0x2da   : > { %v1054_v43 = vadd.f32 %v1053_v42, %v1052_v26 }
 0x2dc   : > { %v1055_v44 = vrot.slane %v1054_v43, 1 }
 0x2de   : > { %v1056_v30 = vadd.f32 %v1055_v44, %v1054_v43 }
 0x2e0   : > { %v1057_v45 = vmul.f32 0.5, %v1056_v30 }
 0x2e2   : > { %1281 = vtanh.f32 %v1057_v45 }
 0x2e8   : > { %v1282_v41 = vpop.eup %1281 }
 0x2e9   : > { %v1059_v46 = vadd.f32 1.0, %v1282_v41 }
 0x2eb   : > { %v1060_v47 = vmul.f32 0.5, %v1059_v46 }
 0x2ed   : > { %1061 = vst [vmem:[%s1741_s6] sm:$0x1] %v1060_v47 }
 0x2ee PF: > { %s16_s23 = sadd.s32 1, %s1305_s23   ;;  %s1756_s21 = smov %s1301_s22 }
 0x2ef   : > { %p13_p7 = scmp.ge.s32.totalorder %s16_s23, 4   ;;  %s1757_s22 = smov %s1759_s24 }
 0x2f1   :  { %15 = sbr.rel (!%p13_p7) target bundleno = 2 (0x2), region = 88 }

</bundles_post_ra>
